<compile_context>
chip_gen: v7x
topology: tpu7x:2x2x1
jax: 0.10.0
libtpu: 0.0.40
codegen_flags: <defaults>
</compile_context>

<pallas_src>
from functools import partial

import jax
import jax.numpy as jnp
from jax.experimental import pallas as pl
from jax.experimental.pallas import tpu as pltpu


def _video_classifier_kernel(x_ref, w_ref, b_ref, o_ref, *, T, D):
    # x_ref: (TB, T*D)   lane-dense input tile (original dtype)
    # w_ref: (D, C_pad)  weight pre-scaled by 1/T, transposed, class-padded
    # b_ref: (1, C_pad)  f32 bias, class-padded
    # o_ref: (TB, C_pad) lane-dense output tile
    xs = x_ref[:, 0:D].astype(jnp.float32)          # temporal sum in f32
    for t in range(1, T):                            # T static unrolled adds (VALU)
        xs = xs + x_ref[:, t * D:(t + 1) * D].astype(jnp.float32)
    logits = jnp.dot(xs.astype(w_ref.dtype), w_ref[...],   # canonical MK x KN on MXU
                     preferred_element_type=jnp.float32)
    o_ref[...] = (logits + b_ref[...]).astype(o_ref.dtype)


def _default_vmem_limit_bytes():
    """~3/4 of physical VMEM, capped at 100 MiB (v7x ~48 MiB, v5e/v6e ~96 MiB)."""
    cap = None
    try:
        cap = getattr(pltpu.get_tpu_info(), "vmem_capacity_bytes", None)
    except Exception:
        cap = None
    if not cap:
        cap = 128 * 1024 * 1024
    return int(min(cap * 3 // 4, 100 * 1024 * 1024))


def _choose_batch_tile(B, T, D, C_pad, x_itemsize, w_itemsize, vmem_budget_bytes,
                       *, min_steps=4):
    """Largest batch tile fitting the honest VMEM budget, keeping >= min_steps grid steps."""
    if B < 8:
        return B                                   # tiny batch: full-dim single block
    # Resident parameter footprint (conservatively assume 2 buffers each).
    resident = 2 * (D * C_pad * w_itemsize + C_pad * 4)
    avail = max(vmem_budget_bytes - resident, vmem_budget_bytes // 8)
    # Per-row cost of pipelined tensors: double-buffered x tile + f32-sized out tile.
    per_row = 2 * T * D * x_itemsize + 2 * C_pad * 4
    max_rows = max(8, (avail // per_row) // 8 * 8)
    # Keep >= min_steps grid steps (>= 2 per v7x TensorCore) so both cores stream
    # their own HBM path and the input DMA pipeline is active.
    steps_cap = max(8, (B // min_steps) // 8 * 8)
    return min(max_rows, steps_cap)


def video_classifier_forward(x, weight, bias, *, batch_tile=None, vmem_limit_bytes=None):
    """x: (B, T, D); weight: (C, D) [PyTorch Linear layout]; bias: (C,) -> (B, C)."""
    B, T, D = x.shape
    C = weight.shape[0]
    out_dtype = x.dtype

    if vmem_limit_bytes is None:
        vmem_limit_bytes = _default_vmem_limit_bytes()

    # Lane-dense output: pad class dim to a multiple of 128 (zeros, sliced off).
    C_pad = pl.cdiv(C, 128) * 128

    # Fold 1/T into the weight (f32 math), pad classes, pre-transpose to (D, C_pad).
    # For low-precision activations, feed the MXU in that dtype (native rate);
    # accumulation stays f32 via preferred_element_type.
    low_precision = jnp.issubdtype(x.dtype, jnp.floating) and jnp.dtype(x.dtype).itemsize < 4
    w_dtype = x.dtype if low_precision else weight.dtype
    w_p = jnp.pad(weight.astype(jnp.float32) * (1.0 / T),
                  ((0, C_pad - C), (0, 0))).T.astype(w_dtype)          # (D, C_pad)
    b_p = jnp.pad(bias.astype(jnp.float32), (0, C_pad - C)).reshape(1, C_pad)

    # Free reshape of contiguous trailing dims -> lane-dense 2-D input.
    x2 = x.reshape(B, T * D)

    x_itemsize = jnp.dtype(x.dtype).itemsize
    w_itemsize = jnp.dtype(w_dtype).itemsize
    TB = batch_tile if batch_tile is not None else _choose_batch_tile(
        B, T, D, C_pad, x_itemsize, w_itemsize, vmem_limit_bytes)
    grid = (pl.cdiv(B, TB),)                       # no host-side batch pad; partial
                                                   # last block is masked by Pallas
    kernel = partial(_video_classifier_kernel, T=T, D=D)

    def call(single_buffer_params):
        param_kwargs = (dict(pipeline_mode=pl.Buffered(1))
                        if single_buffer_params else {})
        return pl.pallas_call(
            kernel,
            out_shape=jax.ShapeDtypeStruct((B, C_pad), out_dtype),
            grid_spec=pl.GridSpec(
                grid=grid,
                in_specs=[
                    pl.BlockSpec((TB, T * D), lambda i: (i, 0)),            # streamed x
                    pl.BlockSpec((D, C_pad), lambda i: (0, 0), **param_kwargs),  # resident W^T
                    pl.BlockSpec((1, C_pad), lambda i: (0, 0), **param_kwargs),  # resident bias
                ],
                out_specs=pl.BlockSpec((TB, C_pad), lambda i: (i, 0)),
            ),
            compiler_params=pltpu.CompilerParams(
                dimension_semantics=("parallel",),   # shard batch steps across TCs
                vmem_limit_bytes=vmem_limit_bytes),
        )(x2, w_p, b_p)

    try:
        out = call(True)
    except Exception:
        # Fallback if this JAX build rejects pipeline_mode=pl.Buffered(1);
        # identical kernel, default double-buffered parameter blocks.
        out = call(False)

    return out[:, :C]


if __name__ == "__main__":
    # Small shapes implied by the forward: batch=2, seq(T)=8, input_dim=32, classes=10
    B, T, D, C = 2, 8, 32, 10

    key = jax.random.PRNGKey(0)
    kx, kw, kb = jax.random.split(key, 3)

    x = jax.random.normal(kx, (B, T, D), dtype=jnp.float32)

    # Deterministic parameter init mimicking nn.Linear default (uniform +/- 1/sqrt(D))
    bound = 1.0 / jnp.sqrt(jnp.float32(D))
    weight = jax.random.uniform(kw, (C, D), minval=-bound, maxval=bound,
                                dtype=jnp.float32)
    bias = jax.random.uniform(kb, (C,), minval=-bound, maxval=bound,
                              dtype=jnp.float32)

    out = jax.block_until_ready(video_classifier_forward(x, weight, bias))
    ref = x.mean(axis=1) @ weight.T + bias
    assert out.shape == (B, C)
    assert jnp.allclose(out, ref, atol=1e-4, rtol=1e-5)

    # Multi-step grid with an explicit tile and a partial (masked) last block.
    B2 = 40
    x2 = jax.random.normal(jax.random.PRNGKey(1), (B2, T, D), dtype=jnp.float32)
    out2 = jax.block_until_ready(
        video_classifier_forward(x2, weight, bias, batch_tile=16))
    ref2 = x2.mean(axis=1) @ weight.T + bias
    assert out2.shape == (B2, C)
    assert jnp.allclose(out2, ref2, atol=1e-4, rtol=1e-5)

    # Auto-chosen tile, batch not a multiple of 8 (partial last block, >=2 steps).
    B3 = 33
    x3 = jax.random.normal(jax.random.PRNGKey(2), (B3, T, D), dtype=jnp.float32)
    out3 = jax.block_until_ready(video_classifier_forward(x3, weight, bias))
    ref3 = x3.mean(axis=1) @ weight.T + bias
    assert out3.shape == (B3, C)
    assert jnp.allclose(out3, ref3, atol=1e-4, rtol=1e-5)

    print("KERNEL_OK")
</pallas_src>

<mosaic_0001>
module attributes {stable_mosaic.version = 11 : i64} {
  func.func @_video_classifier_kernel(%arg0: i32, %arg1: memref<2x256xf32, #tpu.memory_space<vmem>>, %arg2: memref<32x128xf32, #tpu.memory_space<vmem>>, %arg3: memref<1x128xf32, #tpu.memory_space<vmem>>, %arg4: memref<2x128xf32, #tpu.memory_space<vmem>>) attributes {dimension_semantics = [#tpu.dimension_semantics<parallel>], iteration_bounds = array<i64: 1>, scalar_prefetch = 0 : i64, scratch_operands = 0 : i64, tpu.core_type = #tpu.core_type<tc>, window_params = [{transform_indices = @transform_0, window_bounds = array<i64: 2, 256>}, {pipeline_mode = #tpu.pipeline_mode<synchronous>, transform_indices = @transform_1, window_bounds = array<i64: 32, 128>}, {pipeline_mode = #tpu.pipeline_mode<synchronous>, transform_indices = @transform_2, window_bounds = array<i64: 1, 128>}, {transform_indices = @transform_3, window_bounds = array<i64: 2, 128>}]} {
    %c0 = arith.constant 0 : index
    %c0_0 = arith.constant 0 : index
    %0 = vector.load %arg1[%c0, %c0_0] : memref<2x256xf32, #tpu.memory_space<vmem>>, vector<2x32xf32>
    %c0_1 = arith.constant 0 : index
    %c32 = arith.constant 32 : index
    %1 = vector.load %arg1[%c0_1, %c32] : memref<2x256xf32, #tpu.memory_space<vmem>>, vector<2x32xf32>
    %2 = arith.addf %0, %1 : vector<2x32xf32>
    %c0_2 = arith.constant 0 : index
    %c64 = arith.constant 64 : index
    %3 = vector.load %arg1[%c0_2, %c64] : memref<2x256xf32, #tpu.memory_space<vmem>>, vector<2x32xf32>
    %4 = arith.addf %2, %3 : vector<2x32xf32>
    %c0_3 = arith.constant 0 : index
    %c96 = arith.constant 96 : index
    %5 = vector.load %arg1[%c0_3, %c96] : memref<2x256xf32, #tpu.memory_space<vmem>>, vector<2x32xf32>
    %6 = arith.addf %4, %5 : vector<2x32xf32>
    %c0_4 = arith.constant 0 : index
    %c128 = arith.constant 128 : index
    %7 = vector.load %arg1[%c0_4, %c128] : memref<2x256xf32, #tpu.memory_space<vmem>>, vector<2x32xf32>
    %8 = arith.addf %6, %7 : vector<2x32xf32>
    %c0_5 = arith.constant 0 : index
    %c160 = arith.constant 160 : index
    %9 = vector.load %arg1[%c0_5, %c160] : memref<2x256xf32, #tpu.memory_space<vmem>>, vector<2x32xf32>
    %10 = arith.addf %8, %9 : vector<2x32xf32>
    %c0_6 = arith.constant 0 : index
    %c192 = arith.constant 192 : index
    %11 = vector.load %arg1[%c0_6, %c192] : memref<2x256xf32, #tpu.memory_space<vmem>>, vector<2x32xf32>
    %12 = arith.addf %10, %11 : vector<2x32xf32>
    %c0_7 = arith.constant 0 : index
    %c224 = arith.constant 224 : index
    %13 = vector.load %arg1[%c0_7, %c224] : memref<2x256xf32, #tpu.memory_space<vmem>>, vector<2x32xf32>
    %14 = arith.addf %12, %13 : vector<2x32xf32>
    %c0_8 = arith.constant 0 : index
    %c0_9 = arith.constant 0 : index
    %15 = vector.load %arg2[%c0_8, %c0_9] : memref<32x128xf32, #tpu.memory_space<vmem>>, vector<32x128xf32>
    %cst = arith.constant dense<0.000000e+00> : vector<2x128xf32>
    %16 = tpu.matmul %14, %15, %cst {dimension_numbers = #tpu.dot_dimension_numbers<[1], [0], [0], [1], [0, 0, 1, 1], [], []>} : vector<2x32xf32>, vector<32x128xf32>, vector<2x128xf32> -> vector<2x128xf32>
    %c0_10 = arith.constant 0 : index
    %c0_11 = arith.constant 0 : index
    %17 = vector.load %arg3[%c0_10, %c0_11] : memref<1x128xf32, #tpu.memory_space<vmem>>, vector<1x128xf32>
    %18 = vector.broadcast %17 : vector<1x128xf32> to vector<2x128xf32>
    %19 = arith.addf %16, %18 : vector<2x128xf32>
    %c0_12 = arith.constant 0 : index
    %c0_13 = arith.constant 0 : index
    %20 = vector.load %arg4[%c0_12, %c0_13] : memref<2x128xf32, #tpu.memory_space<vmem>>, vector<2x128xf32>
    tpu.vector_store %arg4[%c0_12, %c0_13], %19 {strides = array<i32>} : memref<2x128xf32, #tpu.memory_space<vmem>>, vector<2x128xf32>,
    return
  }
  func.func @transform_0(%arg0: i32) -> (i32, i32) {
    %c0_i32 = arith.constant 0 : i32
    %c0_i32_0 = arith.constant 0 : i32
    return %arg0, %c0_i32 : i32, i32
  }
  func.func @transform_1(%arg0: i32) -> (i32, i32) {
    %c0_i32 = arith.constant 0 : i32
    %c0_i32_0 = arith.constant 0 : i32
    %c0_i32_1 = arith.constant 0 : i32
    return %c0_i32, %c0_i32_0 : i32, i32
  }
  func.func @transform_2(%arg0: i32) -> (i32, i32) {
    %c0_i32 = arith.constant 0 : i32
    %c0_i32_0 = arith.constant 0 : i32
    %c0_i32_1 = arith.constant 0 : i32
    return %c0_i32, %c0_i32_0 : i32, i32
  }
  func.func @transform_3(%arg0: i32) -> (i32, i32) {
    %c0_i32 = arith.constant 0 : i32
    %c0_i32_0 = arith.constant 0 : i32
    return %arg0, %c0_i32 : i32, i32
  }
}

module attributes {stable_mosaic.version = 11 : i64} {
  func.func @_video_classifier_kernel(%arg0: i32, %arg1: memref<2x256xf32, #tpu.memory_space<vmem>>, %arg2: memref<32x128xf32, #tpu.memory_space<vmem>>, %arg3: memref<1x128xf32, #tpu.memory_space<vmem>>, %arg4: memref<2x128xf32, #tpu.memory_space<vmem>>) attributes {dimension_semantics = [#tpu.dimension_semantics<parallel>], iteration_bounds = array<i64: 1>, scalar_prefetch = 0 : i64, scratch_operands = 0 : i64, tpu.core_type = #tpu.core_type<tc>, window_params = [{transform_indices = @transform_0, window_bounds = array<i64: 2, 256>}, {pipeline_mode = #tpu.pipeline_mode<synchronous>, transform_indices = @transform_1, window_bounds = array<i64: 32, 128>}, {pipeline_mode = #tpu.pipeline_mode<synchronous>, transform_indices = @transform_2, window_bounds = array<i64: 1, 128>}, {transform_indices = @transform_3, window_bounds = array<i64: 2, 128>}]} {
    %c0 = arith.constant 0 : index
    %c0_0 = arith.constant 0 : index
    %0 = vector.load %arg1[%c0, %c0_0] : memref<2x256xf32, #tpu.memory_space<vmem>>, vector<2x32xf32>
    %c0_1 = arith.constant 0 : index
    %c32 = arith.constant 32 : index
    %1 = vector.load %arg1[%c0_1, %c32] : memref<2x256xf32, #tpu.memory_space<vmem>>, vector<2x32xf32>
    %2 = arith.addf %0, %1 : vector<2x32xf32>
    %c0_2 = arith.constant 0 : index
    %c64 = arith.constant 64 : index
    %3 = vector.load %arg1[%c0_2, %c64] : memref<2x256xf32, #tpu.memory_space<vmem>>, vector<2x32xf32>
    %4 = arith.addf %2, %3 : vector<2x32xf32>
    %c0_3 = arith.constant 0 : index
    %c96 = arith.constant 96 : index
    %5 = vector.load %arg1[%c0_3, %c96] : memref<2x256xf32, #tpu.memory_space<vmem>>, vector<2x32xf32>
    %6 = arith.addf %4, %5 : vector<2x32xf32>
    %c0_4 = arith.constant 0 : index
    %c128 = arith.constant 128 : index
    %7 = vector.load %arg1[%c0_4, %c128] : memref<2x256xf32, #tpu.memory_space<vmem>>, vector<2x32xf32>
    %8 = arith.addf %6, %7 : vector<2x32xf32>
    %c0_5 = arith.constant 0 : index
    %c160 = arith.constant 160 : index
    %9 = vector.load %arg1[%c0_5, %c160] : memref<2x256xf32, #tpu.memory_space<vmem>>, vector<2x32xf32>
    %10 = arith.addf %8, %9 : vector<2x32xf32>
    %c0_6 = arith.constant 0 : index
    %c192 = arith.constant 192 : index
    %11 = vector.load %arg1[%c0_6, %c192] : memref<2x256xf32, #tpu.memory_space<vmem>>, vector<2x32xf32>
    %12 = arith.addf %10, %11 : vector<2x32xf32>
    %c0_7 = arith.constant 0 : index
    %c224 = arith.constant 224 : index
    %13 = vector.load %arg1[%c0_7, %c224] : memref<2x256xf32, #tpu.memory_space<vmem>>, vector<2x32xf32>
    %14 = arith.addf %12, %13 : vector<2x32xf32>
    %c0_8 = arith.constant 0 : index
    %c0_9 = arith.constant 0 : index
    %15 = vector.load %arg2[%c0_8, %c0_9] : memref<32x128xf32, #tpu.memory_space<vmem>>, vector<32x128xf32>
    %cst = arith.constant dense<0.000000e+00> : vector<2x128xf32>
    %16 = tpu.matmul %14, %15, %cst {dimension_numbers = #tpu.dot_dimension_numbers<[1], [0], [0], [1], [0, 0, 1, 1], [], []>} : vector<2x32xf32>, vector<32x128xf32>, vector<2x128xf32> -> vector<2x128xf32>
    %c0_10 = arith.constant 0 : index
    %c0_11 = arith.constant 0 : index
    %17 = vector.load %arg3[%c0_10, %c0_11] : memref<1x128xf32, #tpu.memory_space<vmem>>, vector<1x128xf32>
    %18 = vector.broadcast %17 : vector<1x128xf32> to vector<2x128xf32>
    %19 = arith.addf %16, %18 : vector<2x128xf32>
    %c0_12 = arith.constant 0 : index
    %c0_13 = arith.constant 0 : index
    %20 = vector.load %arg4[%c0_12, %c0_13] : memref<2x128xf32, #tpu.memory_space<vmem>>, vector<2x128xf32>
    tpu.vector_store %arg4[%c0_12, %c0_13], %19 {strides = array<i32>} : memref<2x128xf32, #tpu.memory_space<vmem>>, vector<2x128xf32>,
    return
  }
  func.func @transform_0(%arg0: i32) -> (i32, i32) {
    %c0_i32 = arith.constant 0 : i32
    %c0_i32_0 = arith.constant 0 : i32
    return %arg0, %c0_i32 : i32, i32
  }
  func.func @transform_1(%arg0: i32) -> (i32, i32) {
    %c0_i32 = arith.constant 0 : i32
    %c0_i32_0 = arith.constant 0 : i32
    %c0_i32_1 = arith.constant 0 : i32
    return %c0_i32, %c0_i32_0 : i32, i32
  }
  func.func @transform_2(%arg0: i32) -> (i32, i32) {
    %c0_i32 = arith.constant 0 : i32
    %c0_i32_0 = arith.constant 0 : i32
    %c0_i32_1 = arith.constant 0 : i32
    return %c0_i32, %c0_i32_0 : i32, i32
  }
  func.func @transform_3(%arg0: i32) -> (i32, i32) {
    %c0_i32 = arith.constant 0 : i32
    %c0_i32_0 = arith.constant 0 : i32
    return %arg0, %c0_i32 : i32, i32
  }
}

</mosaic_0001>

<bundles_post_ra>
// kernel: tpu_custom_call.1
= control target key start
LH: loop header
LB: loop body
LE: loop exit
PB: predicated region body
PF: predicated region fallthrough
CT: control target
= control target key end

     0   :  { %8 = vsyncpa [#allocation3], 0  ;;  %s393_s0 = inlined_call_operand.hbm [shape: f32[2,256], index: 0, kind: input, shape index: {}]   ;;  %s394_s1 = inlined_call_operand.hbm [shape: f32[32,128], index: 1, kind: input, shape index: {}]   ;;  %s395_s2 = inlined_call_operand.hbm [shape: f32[1,128], index: 2, kind: input, shape index: {}]   ;;  %s396_s3 = inlined_call_operand.hbm [shape: f32[2,128], index: 3, kind: output, shape index: {}]  }
   0x1   :  { %9 = vsyncpa [#allocation6], 0 }
   0x2   :  { %10 = vsyncpa [#allocation4], 0  ;;  %s313_s12 = smov [#allocation5]   ;;  %s219_s16 = scalar_lea.hbm %s394_s1, 512 }
   0x3   :  { %s26_s13 = sshll.u32 %s313_s12, 4  ;;  %p220_p0 = scmp.ne.s32.totalorder %s394_s1, %s219_s16  ;;  %s27_s13 = int_to_ptr.vmem [resolvable:$true] %s26_s13 }
   0x4   :  { %p223_p1 = scmp.lt.u32.totalorder %s219_s16, %s394_s1 }
   0x6   :  { %p225_p2 = pnand %p223_p1, %p220_p0 }
   0x8   :  { %228 = shalt.err (!%p225_p2)
}
   0x9   :  { %s229_s21 = scalar_lea.vmem %s27_s13, 512  ;;  %p234_p4 = scmp.lt.s32.totalorder %s27_s13, %s27_s13 }
   0xa   :  { %p230_p3 = scmp.ne.s32.totalorder %s27_s13, %s229_s21  ;;  %p235_p5 = scmp.lt.s32.totalorder %s229_s21, %s229_s21 }
   0xc   :  { %p236_p6 = por %p235_p5, %p234_p4 }
   0xe   :  { %p237_p7 = pnand %p236_p6, %p230_p3 }
  0x10   :  { %240 = shalt.err (!%p237_p7)
}
  0x11   :  { %s314_s22 = smov 128   ;;  %s315_s23 = smov 8  }
  0x12   :  { %32 = dma.hbm_to_vmem [thread:$0]  %s394_s1, 512, %s27_s13, [#allocation6], %s314_s22, %s314_s22, %s315_s23  }
  0x13   :  { %s316_s26 = smov [#allocation2]   ;;  %s317_s28 = smov [#allocation7]  }
  0x14   :  { %s17_s27 = sshll.u32 %s316_s26, 4  ;;  %s39_s29 = sshll.u32 %s317_s28, 4  ;;  %s18_s27 = int_to_ptr.vmem [resolvable:$true] %s17_s27  ;;  %s40_s29 = int_to_ptr.vmem [resolvable:$true] %s39_s29 }
  0x15   :  { %s241_s5 = scalar_lea.hbm %s393_s0, 64 }
  0x16   :  { %p242_p8 = scmp.ne.s32.totalorder %s393_s0, %s241_s5  ;;  %p245_p9 = scmp.lt.u32.totalorder %s241_s5, %s393_s0 }
  0x18   :  { %p247_p10 = pnand %p245_p9, %p242_p8 }
  0x1a   :  { %250 = shalt.err (!%p247_p10)
}
  0x1b   :  { %s251_s1 = scalar_lea.vmem %s18_s27, 64  ;;  %p256_p12 = scmp.lt.s32.totalorder %s18_s27, %s18_s27 }
  0x1c   :  { %p252_p11 = scmp.ne.s32.totalorder %s18_s27, %s251_s1  ;;  %p257_p13 = scmp.lt.s32.totalorder %s251_s1, %s251_s1 }
  0x1e   :  { %p258_p0 = por %p257_p13, %p256_p12 }
  0x20   :  { %p259_p1 = pnand %p258_p0, %p252_p11 }
  0x22   :  { %262 = shalt.err (!%p259_p1)
}
  0x23   :  { %20 = dma.hbm_to_vmem [thread:$0]  %s393_s0, 64, %s18_s27, [#allocation3]  }
  0x24   :  { %s263_s14 = scalar_lea.hbm %s395_s2, 16 }
  0x25   :  { %p264_p2 = scmp.ne.s32.totalorder %s395_s2, %s263_s14  ;;  %p267_p3 = scmp.lt.u32.totalorder %s263_s14, %s395_s2 }
  0x27   :  { %p269_p4 = pnand %p267_p3, %p264_p2 }
  0x29   :  { %272 = shalt.err (!%p269_p4)
}
  0x2a   :  { %s273_s19 = scalar_lea.vmem %s40_s29, 16  ;;  %s277_s20 = scalar_lea.vmem %s40_s29, 32 }
  0x2b   :  { %p274_p5 = scmp.ne.s32.totalorder %s40_s29, %s273_s19  ;;  %p278_p6 = scmp.lt.s32.totalorder %s40_s29, %s40_s29 }
  0x2c   :  { %p279_p7 = scmp.lt.s32.totalorder %s277_s20, %s273_s19 }
  0x2e   :  { %p280_p8 = por %p279_p7, %p278_p6 }
  0x30   :  { %p281_p9 = pnand %p280_p8, %p274_p5 }
  0x32   :  { %284 = shalt.err (!%p281_p9)
}
  0x33   :  { %42 = dma.hbm_to_vmem [thread:$0]  %s395_s2, 16, %s40_s29, [#allocation6]  }
  0x34   :  { %307 = dma.done.wait [#allocation3], 64  }
  0x35   :  { %308 = vsyncadd [#allocation3], 4294967232 }
  0x36   :  { %309 = dma.done.wait [#allocation6], 528  }
  0x37   :  { %310 = vsyncadd [#allocation6], 4294966768  ;;  %v318_v0 = vmov 0.0|0.0   ;;  %v52_v1 = vld [vmem:[#allocation2] sm:$0x3]  ;;  %v81_v2 = vld [vmem:[#allocation5] sm:$0xff] }
  0x38   :  { %201 = vmatprep.subr.bf16.mxu0 %v318_v0  ;;  %s319_s22 = smov 96   ;;  %s320_s23 = smov 32   ;;  %v82_v3 = vld [vmem:[#allocation5 + $0x8] sm:$0xff]  ;;  %v83_v4 = vld [vmem:[#allocation5 + $0x10] sm:$0xff]  ;;  %v84_v5 = vld [vmem:[#allocation5 + $0x18] sm:$0xff]  ;;  %vm321_vm0 = vmmov 0  }
  0x39   :  { %54 = vrot.lane.b32.xlu0 %v52_v1, %s319_s22  ;;  %62 = vrot.lane.b32.xlu1 %v52_v1, %s320_s23  ;;  %v66_v6 = vld [vmem:[#allocation2 + $0x2] sm:$0x3]  ;;  %v202_v7 = vpack.c.bf16 %v82_v3, %v81_v2  ;;  %v322_v8 = vmov 0.0   ;;  %v205_v9 = vpack.c.bf16 %v84_v5, %v83_v4  ;;  %s323_s2 = smov 64   ;;  %vm92_vm1 = vcmask 261120   ;;  %s324_s24 = smov [#allocation8]  }
  0x3a   :  { %198 = vmatprep.mubr.msk.f32.mxu0 %vm321_vm0, %v322_v8  ;;  %v183_v23 = vld [vmem:[#allocation7] ss:$0 sm:$0xff]  ;;  %s173_s25 = sshll.u32 %s324_s24, 4  ;;  %s174_s25 = int_to_ptr.vmem [resolvable:$true] %s173_s25 }
  0x3b   :  { %203 = vmatpush3.bf16.msra.mxu0 %v202_v7  ;;  %s285_s26 = scalar_lea.vmem %s174_s25, 32  ;;  %p290_p11 = scmp.lt.s32.totalorder %s174_s25, %s174_s25 }
  0x3c   :  { %204 = vmatprep.subr.bf16.mxu0 %v318_v0  ;;  %p286_p10 = scmp.ne.s32.totalorder %s174_s25, %s285_s26  ;;  %p291_p12 = scmp.lt.s32.totalorder %s285_s26, %s285_s26 }
  0x3d   :  { %58 = vrot.lane.b32.xlu0 %v52_v1, %s323_s2  ;;  %69 = vrot.lane.b32.xlu1 %v66_v6, %s319_s22 }
  0x3e   :  { %p292_p13 = por %p291_p12, %p290_p11 }
  0x3f   :  { %206 = vmatpush3.bf16.msra.mxu0 %v205_v9 }
  0x40   :  { %p293_p0 = pnand %p292_p13, %p286_p10 }
  0x41   :  { %73 = vrot.lane.b32.xlu0 %v66_v6, %s323_s2  ;;  %77 = vrot.lane.b32.xlu1 %v66_v6, %s320_s23 }
  0xab   :  { %v55_v10 = vpop.permute.xlu0 %54  ;;  %v63_v11 = vpop.permute.xlu1 %62 }
  0xac   :  { %v57_v12 = vadd.f32 %v55_v10, %v52_v1 }
  0xaf   :  { %v59_v13 = vpop.permute.xlu0 %58  ;;  %v70_v15 = vpop.permute.xlu1 %69 }
  0xb0   :  { %v61_v14 = vadd.f32 %v59_v13, %v57_v12 }
  0xb2   :  { %v65_v16 = vadd.f32 %v63_v11, %v61_v14 }
  0xb3   :  { %v74_v18 = vpop.permute.xlu0 %73  ;;  %v78_v20 = vpop.permute.xlu1 %77 }
  0xb4   :  { %v67_v17 = vadd.f32 %v66_v6, %v65_v16 }
  0xb6   :  { %v72_v19 = vadd.f32 %v70_v15, %v67_v17 }
  0xb8   :  { %v76_v21 = vadd.f32 %v74_v18, %v72_v19 }
  0xba   :  { %v80_v22 = vadd.f32 %v78_v20, %v76_v21 }
  0xbc   :  { %199 = vmatmul.mubr.msk.f32.vlgmr.msra.gmra.mrb[0].mxu0 %vm92_vm1, %v80_v22 }
 0x18f   :  { %v162_v24 = vpop.f32.mrb[0].mxu0 }
 0x190   :  { %v163_v25 = vadd.f32 %v183_v23, %v162_v24  ;;  %v200_v26 = vpop.f32.mrb[1].mxu0 }
 0x192   :  { %166 = vst [vmem:[#allocation8] sm:$0x3] %v163_v25 }
 0x193   :  { %296 = shalt.err (!%p293_p0)
}
 0x194   :  { %s297_s29 = scalar_lea.hbm %s396_s3, 32 }
 0x195   :  { %p298_p1 = scmp.ne.s32.totalorder %s396_s3, %s297_s29  ;;  %p301_p2 = scmp.lt.u32.totalorder %s297_s29, %s396_s3 }
 0x197   :  { %p303_p3 = pnand %p301_p2, %p298_p1 }
 0x199   :  { %306 = shalt.err (!%p303_p3)
}
 0x19a   :  { %176 = dma.vmem_to_hbm [thread:$0]  %s174_s25, 32, %s396_s3, [#allocation4]  }
 0x19b   :  { %311 = dma.done.wait [#allocation4], 32  }
 0x19c   :  { %312 = vsyncadd [#allocation4], 4294967264 }
 0x19d   :  { %180 = vsyncpa [#allocation3], 1 }
 0x19e   :  { %181 = vsyncpa [#allocation6], 1 }
 0x19f   :  { %182 = vsyncpa [#allocation4], 1 }

// kernel: tpu_custom_call.1
= control target key start
LH: loop header
LB: loop body
LE: loop exit
PB: predicated region body
PF: predicated region fallthrough
CT: control target
= control target key end

     0   :  { %8 = vsyncpa [#allocation3], 0  ;;  %s393_s0 = inlined_call_operand.hbm [shape: f32[2,256], index: 0, kind: input, shape index: {}]   ;;  %s394_s1 = inlined_call_operand.hbm [shape: f32[32,128], index: 1, kind: input, shape index: {}]   ;;  %s395_s2 = inlined_call_operand.hbm [shape: f32[1,128], index: 2, kind: input, shape index: {}]   ;;  %s396_s3 = inlined_call_operand.hbm [shape: f32[2,128], index: 3, kind: output, shape index: {}]  }
   0x1   :  { %9 = vsyncpa [#allocation6], 0 }
   0x2   :  { %10 = vsyncpa [#allocation4], 0  ;;  %s313_s12 = smov [#allocation5]   ;;  %s219_s16 = scalar_lea.hbm %s394_s1, 512 }
   0x3   :  { %s26_s13 = sshll.u32 %s313_s12, 4  ;;  %p220_p0 = scmp.ne.s32.totalorder %s394_s1, %s219_s16  ;;  %s27_s13 = int_to_ptr.vmem [resolvable:$true] %s26_s13 }
   0x4   :  { %p223_p1 = scmp.lt.u32.totalorder %s219_s16, %s394_s1 }
   0x6   :  { %p225_p2 = pnand %p223_p1, %p220_p0 }
   0x8   :  { %228 = shalt.err (!%p225_p2)
}
   0x9   :  { %s229_s21 = scalar_lea.vmem %s27_s13, 512  ;;  %p234_p4 = scmp.lt.s32.totalorder %s27_s13, %s27_s13 }
   0xa   :  { %p230_p3 = scmp.ne.s32.totalorder %s27_s13, %s229_s21  ;;  %p235_p5 = scmp.lt.s32.totalorder %s229_s21, %s229_s21 }
   0xc   :  { %p236_p6 = por %p235_p5, %p234_p4 }
   0xe   :  { %p237_p7 = pnand %p236_p6, %p230_p3 }
  0x10   :  { %240 = shalt.err (!%p237_p7)
}
  0x11   :  { %s314_s22 = smov 128   ;;  %s315_s23 = smov 8  }
  0x12   :  { %32 = dma.hbm_to_vmem [thread:$0]  %s394_s1, 512, %s27_s13, [#allocation6], %s314_s22, %s314_s22, %s315_s23  }
  0x13   :  { %s316_s26 = smov [#allocation2]   ;;  %s317_s28 = smov [#allocation7]  }
  0x14   :  { %s17_s27 = sshll.u32 %s316_s26, 4  ;;  %s39_s29 = sshll.u32 %s317_s28, 4  ;;  %s18_s27 = int_to_ptr.vmem [resolvable:$true] %s17_s27  ;;  %s40_s29 = int_to_ptr.vmem [resolvable:$true] %s39_s29 }
  0x15   :  { %s241_s5 = scalar_lea.hbm %s393_s0, 64 }
  0x16   :  { %p242_p8 = scmp.ne.s32.totalorder %s393_s0, %s241_s5  ;;  %p245_p9 = scmp.lt.u32.totalorder %s241_s5, %s393_s0 }
  0x18   :  { %p247_p10 = pnand %p245_p9, %p242_p8 }
  0x1a   :  { %250 = shalt.err (!%p247_p10)
}
  0x1b   :  { %s251_s1 = scalar_lea.vmem %s18_s27, 64  ;;  %p256_p12 = scmp.lt.s32.totalorder %s18_s27, %s18_s27 }
  0x1c   :  { %p252_p11 = scmp.ne.s32.totalorder %s18_s27, %s251_s1  ;;  %p257_p13 = scmp.lt.s32.totalorder %s251_s1, %s251_s1 }
  0x1e   :  { %p258_p0 = por %p257_p13, %p256_p12 }
  0x20   :  { %p259_p1 = pnand %p258_p0, %p252_p11 }
  0x22   :  { %262 = shalt.err (!%p259_p1)
}
  0x23   :  { %20 = dma.hbm_to_vmem [thread:$0]  %s393_s0, 64, %s18_s27, [#allocation3]  }
  0x24   :  { %s263_s14 = scalar_lea.hbm %s395_s2, 16 }
  0x25   :  { %p264_p2 = scmp.ne.s32.totalorder %s395_s2, %s263_s14  ;;  %p267_p3 = scmp.lt.u32.totalorder %s263_s14, %s395_s2 }
  0x27   :  { %p269_p4 = pnand %p267_p3, %p264_p2 }
  0x29   :  { %272 = shalt.err (!%p269_p4)
}
  0x2a   :  { %s273_s19 = scalar_lea.vmem %s40_s29, 16  ;;  %s277_s20 = scalar_lea.vmem %s40_s29, 32 }
  0x2b   :  { %p274_p5 = scmp.ne.s32.totalorder %s40_s29, %s273_s19  ;;  %p278_p6 = scmp.lt.s32.totalorder %s40_s29, %s40_s29 }
  0x2c   :  { %p279_p7 = scmp.lt.s32.totalorder %s277_s20, %s273_s19 }
  0x2e   :  { %p280_p8 = por %p279_p7, %p278_p6 }
  0x30   :  { %p281_p9 = pnand %p280_p8, %p274_p5 }
  0x32   :  { %284 = shalt.err (!%p281_p9)
}
  0x33   :  { %42 = dma.hbm_to_vmem [thread:$0]  %s395_s2, 16, %s40_s29, [#allocation6]  }
  0x34   :  { %307 = dma.done.wait [#allocation3], 64  }
  0x35   :  { %308 = vsyncadd [#allocation3], 4294967232 }
  0x36   :  { %309 = dma.done.wait [#allocation6], 528  }
  0x37   :  { %310 = vsyncadd [#allocation6], 4294966768  ;;  %v318_v0 = vmov 0.0|0.0   ;;  %v52_v1 = vld [vmem:[#allocation2] sm:$0x3]  ;;  %v81_v2 = vld [vmem:[#allocation5] sm:$0xff] }
  0x38   :  { %201 = vmatprep.subr.bf16.mxu0 %v318_v0  ;;  %s319_s22 = smov 96   ;;  %s320_s23 = smov 32   ;;  %v82_v3 = vld [vmem:[#allocation5 + $0x8] sm:$0xff]  ;;  %v83_v4 = vld [vmem:[#allocation5 + $0x10] sm:$0xff]  ;;  %v84_v5 = vld [vmem:[#allocation5 + $0x18] sm:$0xff]  ;;  %vm321_vm0 = vmmov 0  }
  0x39   :  { %54 = vrot.lane.b32.xlu0 %v52_v1, %s319_s22  ;;  %62 = vrot.lane.b32.xlu1 %v52_v1, %s320_s23  ;;  %v66_v6 = vld [vmem:[#allocation2 + $0x2] sm:$0x3]  ;;  %v202_v7 = vpack.c.bf16 %v82_v3, %v81_v2  ;;  %v322_v8 = vmov 0.0   ;;  %v205_v9 = vpack.c.bf16 %v84_v5, %v83_v4  ;;  %s323_s2 = smov 64   ;;  %vm92_vm1 = vcmask 261120   ;;  %s324_s24 = smov [#allocation8]  }
  0x3a   :  { %198 = vmatprep.mubr.msk.f32.mxu0 %vm321_vm0, %v322_v8  ;;  %v183_v23 = vld [vmem:[#allocation7] ss:$0 sm:$0xff]  ;;  %s173_s25 = sshll.u32 %s324_s24, 4  ;;  %s174_s25 = int_to_ptr.vmem [resolvable:$true] %s173_s25 }
  0x3b   :  { %203 = vmatpush3.bf16.msra.mxu0 %v202_v7  ;;  %s285_s26 = scalar_lea.vmem %s174_s25, 32  ;;  %p290_p11 = scmp.lt.s32.totalorder %s174_s25, %s174_s25 }
  0x3c   :  { %204 = vmatprep.subr.bf16.mxu0 %v318_v0  ;;  %p286_p10 = scmp.ne.s32.totalorder %s174_s25, %s285_s26  ;;  %p291_p12 = scmp.lt.s32.totalorder %s285_s26, %s285_s26 }
  0x3d   :  { %58 = vrot.lane.b32.xlu0 %v52_v1, %s323_s2  ;;  %69 = vrot.lane.b32.xlu1 %v66_v6, %s319_s22 }
  0x3e   :  { %p292_p13 = por %p291_p12, %p290_p11 }
  0x3f   :  { %206 = vmatpush3.bf16.msra.mxu0 %v205_v9 }
  0x40   :  { %p293_p0 = pnand %p292_p13, %p286_p10 }
  0x41   :  { %73 = vrot.lane.b32.xlu0 %v66_v6, %s323_s2  ;;  %77 = vrot.lane.b32.xlu1 %v66_v6, %s320_s23 }
  0xab   :  { %v55_v10 = vpop.permute.xlu0 %54  ;;  %v63_v11 = vpop.permute.xlu1 %62 }
  0xac   :  { %v57_v12 = vadd.f32 %v55_v10, %v52_v1 }
  0xaf   :  { %v59_v13 = vpop.permute.xlu0 %58  ;;  %v70_v15 = vpop.permute.xlu1 %69 }
  0xb0   :  { %v61_v14 = vadd.f32 %v59_v13, %v57_v12 }
  0xb2   :  { %v65_v16 = vadd.f32 %v63_v11, %v61_v14 }
  0xb3   :  { %v74_v18 = vpop.permute.xlu0 %73  ;;  %v78_v20 = vpop.permute.xlu1 %77 }
  0xb4   :  { %v67_v17 = vadd.f32 %v66_v6, %v65_v16 }
  0xb6   :  { %v72_v19 = vadd.f32 %v70_v15, %v67_v17 }
  0xb8   :  { %v76_v21 = vadd.f32 %v74_v18, %v72_v19 }
  0xba   :  { %v80_v22 = vadd.f32 %v78_v20, %v76_v21 }
  0xbc   :  { %199 = vmatmul.mubr.msk.f32.vlgmr.msra.gmra.mrb[0].mxu0 %vm92_vm1, %v80_v22 }
 0x18f   :  { %v162_v24 = vpop.f32.mrb[0].mxu0 }
 0x190   :  { %v163_v25 = vadd.f32 %v183_v23, %v162_v24  ;;  %v200_v26 = vpop.f32.mrb[1].mxu0 }
 0x192   :  { %166 = vst [vmem:[#allocation8] sm:$0x3] %v163_v25 }
 0x193   :  { %296 = shalt.err (!%p293_p0)
}
 0x194   :  { %s297_s29 = scalar_lea.hbm %s396_s3, 32 }
 0x195   :  { %p298_p1 = scmp.ne.s32.totalorder %s396_s3, %s297_s29  ;;  %p301_p2 = scmp.lt.u32.totalorder %s297_s29, %s396_s3 }
 0x197   :  { %p303_p3 = pnand %p301_p2, %p298_p1 }
 0x199   :  { %306 = shalt.err (!%p303_p3)
}
 0x19a   :  { %176 = dma.vmem_to_hbm [thread:$0]  %s174_s25, 32, %s396_s3, [#allocation4]  }
 0x19b   :  { %311 = dma.done.wait [#allocation4], 32  }
 0x19c   :  { %312 = vsyncadd [#allocation4], 4294967264 }
 0x19d   :  { %180 = vsyncpa [#allocation3], 1 }
 0x19e   :  { %181 = vsyncpa [#allocation6], 1 }
 0x19f   :  { %182 = vsyncpa [#allocation4], 1 }

</bundles_post_ra>
